<compile_context>
chip_gen: v5e
topology: v5e:2x2
jax: 0.10.0
libtpu: 0.0.40
codegen_flags: <defaults>
</compile_context>

<pallas_src>
import functools

import jax
import jax.numpy as jnp
from jax.experimental import pallas as pl
from jax.experimental.pallas import tpu as pltpu

_LANES = 1024               # lane-dense last dim (multiple of 128 -> unmasked vst)
_BLOCK_BYTES = 2 << 20      # ~2 MiB per block (85%+ of HBM roofline regime)
_SMALL_BYTES = 1 << 20      # below this, plain XLA beats a kernel launch

_SQRT_HALF = 0.7071067811865476
# Abramowitz & Stegun 7.1.26 erf coefficients (max abs error 1.5e-7)
_P = 0.3275911
_A1 = 0.254829592
_A2 = -0.284496736
_A3 = 1.421413741
_A4 = -1.453152027
_A5 = 1.061405429


def _gelu_kernel(x_ref, o_ref):
    x = x_ref[...].astype(jnp.float32)
    z = x * _SQRT_HALF
    a = jnp.abs(z)
    # t = 1 / (1 + P*a): approx reciprocal runs on the EUP slot (co-issues with
    # the exp below); one Newton step restores ~f32 accuracy for 2 VALU ops,
    # far cheaper than the full-precision divide expansion.
    d = 1.0 + _P * a
    t0 = pl.reciprocal(d, approx=True)
    t = t0 * (2.0 - d * t0)
    poly = t * (_A1 + t * (_A2 + t * (_A3 + t * (_A4 + t * _A5))))
    # pe = 1 - erf(|z|) = erfc(|z|); exp underflows to 0 for large |z|, so the
    # formula saturates cleanly (y -> x for large positive x, 0 for negative).
    pe = poly * jnp.exp(-(a * a))
    # 1 + erf(z) = 2 - pe  for z >= 0,   pe  for z < 0.
    o_ref[...] = (0.5 * x * jnp.where(z < 0.0, pe, 2.0 - pe)).astype(o_ref.dtype)


def _gelu_xla(x):
    return jax.nn.gelu(x, approximate=False)


@functools.lru_cache(maxsize=1)
def _num_tensorcores() -> int:
    """2 on parts with 2 TCs per device (v7x, v4/v5p megacore); 1 on v5e/v6e."""
    try:
        kind = (getattr(jax.devices()[0], "device_kind", "") or "").lower()
    except Exception:
        return 1
    if "v7" in kind or "v4" in kind or "v5p" in kind:
        return 2
    return 1


def _gelu_impl(x: jax.Array, use_pallas: bool | None = None) -> jax.Array:
    n = x.size
    dtype = x.dtype
    itemsize = jnp.dtype(dtype).itemsize

    pallas_ok = (
        n > 0
        and jnp.issubdtype(dtype, jnp.floating)
        and itemsize <= 4
        # Ragged total sizes go to XLA: avoids the pad + slice extra HBM passes.
        and n % _LANES == 0
    )
    if use_pallas is None:
        use_pallas = n * itemsize >= _SMALL_BYTES
    if not (use_pallas and pallas_ok):
        return _gelu_xla(x)

    orig_shape = x.shape
    rows = n // _LANES
    x2d = x.reshape(rows, _LANES)          # metadata-only under jit

    # Packed-sublane multiple: 8 (f32) / 16 (bf16, f16) / 32 (int8 / fp8).
    sub = 8 * max(1, 4 // itemsize)
    # Scale the block to ~2 MiB regardless of dtype (block_shape is in elements).
    block_rows = max(sub, _BLOCK_BYTES // (_LANES * itemsize))

    if rows > block_rows:
        br = block_rows                                   # ~2 MiB blocks; ragged tail masked
    elif _num_tensorcores() >= 2 and rows >= 2 * sub:
        br = ((rows + 1) // 2 + sub - 1) // sub * sub     # 2 blocks -> feed both TCs (v7x)
    else:
        br = rows                                         # single full-extent block
    grid = (pl.cdiv(rows, br),)

    out2d = pl.pallas_call(
        _gelu_kernel,
        out_shape=jax.ShapeDtypeStruct((rows, _LANES), dtype),
        grid_spec=pltpu.PrefetchScalarGridSpec(
            num_scalar_prefetch=0,
            grid=grid,
            in_specs=[pl.BlockSpec((br, _LANES), lambda i: (i, 0))],
            out_specs=pl.BlockSpec((br, _LANES), lambda i: (i, 0)),
        ),
        compiler_params=pltpu.CompilerParams(
            dimension_semantics=("parallel",),
        ),
        cost_estimate=pl.CostEstimate(
            flops=20 * n,
            transcendentals=2 * n,
            bytes_accessed=2 * n * itemsize,
        ),
    )(x2d)

    return out2d.reshape(orig_shape)


# jit so reshapes fuse and the wrapper is a single dispatch (perf feedback #2).
gelu = jax.jit(_gelu_impl, static_argnames=("use_pallas",))


if __name__ == "__main__":
    key = jax.random.PRNGKey(0)
    k1, k2, k3, k4 = jax.random.split(key, 4)

    # Primary shape implied by the module's usage: NCHW (2, 4, 16, 16)
    x_small = jax.random.normal(k1, (2, 4, 16, 16), dtype=jnp.float32) * 3.0
    y_small = gelu(x_small, use_pallas=True)          # force the Pallas path
    jax.block_until_ready(y_small)
    ref_small = jax.nn.gelu(x_small, approximate=False)
    assert y_small.shape == x_small.shape and y_small.dtype == x_small.dtype
    assert jnp.allclose(y_small, ref_small, atol=1e-5, rtol=1e-5), "small mismatch"

    # Auto path (tiny input -> plain XLA fast path) must agree too
    y_auto = gelu(x_small)
    jax.block_until_ready(y_auto)
    assert jnp.allclose(y_auto, ref_small, atol=1e-5, rtol=1e-5), "fast-path mismatch"

    # Multi-block slab: exercises ~2 MiB blocks and a multi-step "parallel" grid
    x_big = jax.random.normal(k2, (8, 8, 128, 128), dtype=jnp.float32) * 3.0
    y_big = gelu(x_big, use_pallas=True)
    jax.block_until_ready(y_big)
    assert jnp.allclose(y_big, jax.nn.gelu(x_big, approximate=False),
                        atol=1e-5, rtol=1e-5), "big mismatch"

    # bf16: exercises the byte-scaled block size / packed-sublane rounding
    x_bf16 = (jax.random.normal(k3, (4, 8, 64, 128), dtype=jnp.float32) * 3.0
              ).astype(jnp.bfloat16)
    y_bf16 = gelu(x_bf16, use_pallas=True)
    jax.block_until_ready(y_bf16)
    ref_bf16 = jax.nn.gelu(x_bf16.astype(jnp.float32), approximate=False)
    assert y_bf16.dtype == jnp.bfloat16
    assert jnp.allclose(y_bf16.astype(jnp.float32), ref_bf16,
                        atol=2e-2, rtol=2e-2), "bf16 mismatch"

    # Ragged total size: routed to the XLA fast path (no pad/slice HBM passes)
    x_rag = jax.random.normal(k4, (3, 5, 17, 19), dtype=jnp.float32) * 3.0
    y_rag = gelu(x_rag, use_pallas=True)
    jax.block_until_ready(y_rag)
    assert jnp.allclose(y_rag, jax.nn.gelu(x_rag, approximate=False),
                        atol=1e-5, rtol=1e-5), "ragged mismatch"

    print("KERNEL_OK")
</pallas_src>

<mosaic_0001>
module attributes {stable_mosaic.version = 11 : i64} {
  func.func @_gelu_kernel(%arg0: i32, %arg1: memref<2x1024xf32, #tpu.memory_space<vmem>>, %arg2: memref<2x1024xf32, #tpu.memory_space<vmem>>) attributes {dimension_semantics = [#tpu.dimension_semantics<parallel>], iteration_bounds = array<i64: 1>, scalar_prefetch = 0 : i64, scratch_operands = 0 : i64, tpu.core_type = #tpu.core_type<tc>, window_params = [{transform_indices = @transform_0, window_bounds = array<i64: 2, 1024>}, {transform_indices = @transform_1, window_bounds = array<i64: 2, 1024>}]} {
    %c0 = arith.constant 0 : index
    %c0_0 = arith.constant 0 : index
    %0 = vector.load %arg1[%c0, %c0_0] : memref<2x1024xf32, #tpu.memory_space<vmem>>, vector<2x1024xf32>
    %cst = arith.constant 0.707106769 : f32
    %1 = vector.broadcast %cst : f32 to vector<2x1024xf32>
    %2 = arith.mulf %0, %1 : vector<2x1024xf32>
    %3 = math.absf %2 : vector<2x1024xf32>
    %cst_1 = arith.constant 0.327591091 : f32
    %4 = vector.broadcast %cst_1 : f32 to vector<2x1024xf32>
    %5 = arith.mulf %4, %3 : vector<2x1024xf32>
    %cst_2 = arith.constant 1.000000e+00 : f32
    %6 = vector.broadcast %cst_2 : f32 to vector<2x1024xf32>
    %7 = arith.addf %6, %5 : vector<2x1024xf32>
    %8 = tpu.reciprocal %7 {approx = true} : vector<2x1024xf32> -> vector<2x1024xf32>
    %9 = arith.mulf %7, %8 : vector<2x1024xf32>
    %cst_3 = arith.constant 2.000000e+00 : f32
    %10 = vector.broadcast %cst_3 : f32 to vector<2x1024xf32>
    %11 = arith.subf %10, %9 : vector<2x1024xf32>
    %12 = arith.mulf %8, %11 : vector<2x1024xf32>
    %cst_4 = arith.constant 1.06140542 : f32
    %13 = vector.broadcast %cst_4 : f32 to vector<2x1024xf32>
    %14 = arith.mulf %12, %13 : vector<2x1024xf32>
    %cst_5 = arith.constant -1.45315206 : f32
    %15 = vector.broadcast %cst_5 : f32 to vector<2x1024xf32>
    %16 = arith.addf %15, %14 : vector<2x1024xf32>
    %17 = arith.mulf %12, %16 : vector<2x1024xf32>
    %cst_6 = arith.constant 1.42141378 : f32
    %18 = vector.broadcast %cst_6 : f32 to vector<2x1024xf32>
    %19 = arith.addf %18, %17 : vector<2x1024xf32>
    %20 = arith.mulf %12, %19 : vector<2x1024xf32>
    %cst_7 = arith.constant -0.284496725 : f32
    %21 = vector.broadcast %cst_7 : f32 to vector<2x1024xf32>
    %22 = arith.addf %21, %20 : vector<2x1024xf32>
    %23 = arith.mulf %12, %22 : vector<2x1024xf32>
    %cst_8 = arith.constant 0.254829586 : f32
    %24 = vector.broadcast %cst_8 : f32 to vector<2x1024xf32>
    %25 = arith.addf %24, %23 : vector<2x1024xf32>
    %26 = arith.mulf %12, %25 : vector<2x1024xf32>
    %27 = arith.mulf %3, %3 : vector<2x1024xf32>
    %cst_9 = arith.constant 0.000000e+00 : f32
    %28 = vector.broadcast %cst_9 : f32 to vector<2x1024xf32>
    %29 = arith.subf %28, %27 : vector<2x1024xf32>
    %30 = math.exp %29 : vector<2x1024xf32>
    %31 = arith.mulf %26, %30 : vector<2x1024xf32>
    %cst_10 = arith.constant 5.000000e-01 : f32
    %32 = vector.broadcast %cst_10 : f32 to vector<2x1024xf32>
    %33 = arith.mulf %32, %0 : vector<2x1024xf32>
    %cst_11 = arith.constant 0.000000e+00 : f32
    %34 = vector.broadcast %cst_11 : f32 to vector<2x1024xf32>
    %35 = arith.cmpf olt, %2, %34 : vector<2x1024xf32>
    %cst_12 = arith.constant 2.000000e+00 : f32
    %36 = vector.broadcast %cst_12 : f32 to vector<2x1024xf32>
    %37 = arith.subf %36, %31 : vector<2x1024xf32>
    %38 = arith.select %35, %31, %37 : vector<2x1024xi1>, vector<2x1024xf32>
    %39 = arith.mulf %33, %38 : vector<2x1024xf32>
    %c0_13 = arith.constant 0 : index
    %c0_14 = arith.constant 0 : index
    %40 = vector.load %arg2[%c0_13, %c0_14] : memref<2x1024xf32, #tpu.memory_space<vmem>>, vector<2x1024xf32>
    tpu.vector_store %arg2[%c0_13, %c0_14], %39 {strides = array<i32>} : memref<2x1024xf32, #tpu.memory_space<vmem>>, vector<2x1024xf32>,
    return
  }
  func.func @transform_0(%arg0: i32) -> (i32, i32) {
    %c0_i32 = arith.constant 0 : i32
    %c0_i32_0 = arith.constant 0 : i32
    return %arg0, %c0_i32 : i32, i32
  }
  func.func @transform_1(%arg0: i32) -> (i32, i32) {
    %c0_i32 = arith.constant 0 : i32
    %c0_i32_0 = arith.constant 0 : i32
    return %arg0, %c0_i32 : i32, i32
  }
}

</mosaic_0001>

<bundles_post_ra>
// kernel: _gelu_impl.1
= control target key start
LH: loop header
LB: loop body
LE: loop exit
PB: predicated region body
PF: predicated region fallthrough
CT: control target
= control target key end

     0   :  { %s100_s0 = inlined_call_operand.vmem [shape: f32[2,1024], index: 0, kind: input, shape index: {}]   ;;  %s101_s1 = inlined_call_operand.vmem [shape: f32[2,1024], index: 1, kind: output, shape index: {}]  }
   0x1   :  { %v8_v0 = vld [vmem:[%s100_s0] sm:$0xff]  ;;  %v9_v1 = vld [vmem:[%s100_s0 + $0x8] sm:$0xff] }
   0x2   :  { %v10_v2 = vmul.f32 0.70710677, %v8_v0  ;;  %v11_v3 = vmul.f32 0.70710677, %v9_v1  ;;  %v54_v45 = vmul.f32 0.5, %v8_v0  ;;  %v55_v48 = vmul.f32 0.5, %v9_v1 }
   0x4   :  { %v12_v4 = vand.u32 2147483647, %v10_v2  ;;  %v13_v5 = vand.u32 2147483647, %v11_v3  ;;  %vm56_vm0 = vcmp.lt.f32.partialorder %v10_v2, 0.0  ;;  %vm57_vm1 = vcmp.lt.f32.partialorder %v11_v3, 0.0 }
   0x6   :  { %v14_v6 = vmul.f32 0.3275911, %v12_v4  ;;  %v15_v7 = vmul.f32 0.3275911, %v13_v5  ;;  %v44_v15 = vmul.f32 %v12_v4, %v12_v4  ;;  %v45_v18 = vmul.f32 %v13_v5, %v13_v5 }
   0x8   :  { %v16_v8 = vadd.f32 1.0, %v14_v6  ;;  %v17_v9 = vadd.f32 1.0, %v15_v7  ;;  %v46_v21 = vsub.f32 0.0, %v44_v15  ;;  %v47_v24 = vsub.f32 0.0, %v45_v18 }
   0xa   :  { %70 = vrcp.f32 %v16_v8  ;;  %v48_v27 = vmul.f32 1.442695, %v46_v21  ;;  %v50_v30 = vmul.f32 1.442695, %v47_v24 }
   0xb   :  { %72 = vrcp.f32 %v17_v9 }
   0xc   :  { %74 = vpow2.f32 %v48_v27 }
   0xd   :  { %76 = vpow2.f32 %v50_v30 }
  0x10   :  { %v71_v10 = vpop.eup %70 }
  0x11   :  { %v73_v11 = vpop.eup %72  ;;  %v20_v12 = vmul.f32 %v71_v10, %v16_v8 }
  0x12   :  { %v21_v13 = vmul.f32 %v73_v11, %v17_v9  ;;  %v75_v39 = vpop.eup %74 }
  0x13   :  { %v22_v14 = vsub.f32 2.0, %v20_v12  ;;  %v77_v41 = vpop.eup %76 }
  0x14   :  { %v23_v16 = vsub.f32 2.0, %v21_v13 }
  0x15   :  { %v24_v17 = vmul.f32 %v71_v10, %v22_v14 }
  0x16   :  { %v25_v19 = vmul.f32 %v73_v11, %v23_v16 }
  0x17   :  { %v26_v20 = vmul.f32 1.0614054, %v24_v17 }
  0x18   :  { %v27_v22 = vmul.f32 1.0614054, %v25_v19 }
  0x19   :  { %v28_v23 = vadd.f32 -1.4531521, %v26_v20 }
  0x1a   :  { %v29_v25 = vadd.f32 -1.4531521, %v27_v22 }
  0x1b   :  { %v30_v26 = vmul.f32 %v28_v23, %v24_v17 }
  0x1c   :  { %v31_v28 = vmul.f32 %v29_v25, %v25_v19 }
  0x1d   :  { %v32_v29 = vadd.f32 1.4214138, %v30_v26 }
  0x1e   :  { %v33_v31 = vadd.f32 1.4214138, %v31_v28 }
  0x1f   :  { %v34_v32 = vmul.f32 %v32_v29, %v24_v17 }
  0x20   :  { %v35_v33 = vmul.f32 %v33_v31, %v25_v19 }
  0x21   :  { %v36_v34 = vadd.f32 -0.28449672, %v34_v32 }
  0x22   :  { %v37_v35 = vadd.f32 -0.28449672, %v35_v33 }
  0x23   :  { %v38_v36 = vmul.f32 %v36_v34, %v24_v17 }
  0x24   :  { %v39_v37 = vmul.f32 %v37_v35, %v25_v19 }
  0x25   :  { %v40_v38 = vadd.f32 0.2548296, %v38_v36 }
  0x26   :  { %v41_v40 = vadd.f32 0.2548296, %v39_v37 }
  0x27   :  { %v42_v42 = vmul.f32 %v40_v38, %v24_v17 }
  0x28   :  { %v43_v43 = vmul.f32 %v41_v40, %v25_v19 }
  0x29   :  { %v52_v44 = vmul.f32 %v75_v39, %v42_v42 }
  0x2a   :  { %v53_v46 = vmul.f32 %v77_v41, %v43_v43 }
  0x2b   :  { %v58_v47 = vsub.f32 2.0, %v52_v44 }
  0x2c   :  { %v59_v49 = vsub.f32 2.0, %v53_v46 }
  0x2d   :  { %v60_v50 = vsel %vm56_vm0, %v52_v44, %v58_v47 }
  0x2e   :  { %v62_v51 = vmul.f32 %v60_v50, %v54_v45  ;;  %v61_v52 = vsel %vm57_vm1, %v53_v46, %v59_v49 }
  0x2f   :  { %v63_v53 = vmul.f32 %v61_v52, %v55_v48 }
  0x30   :  { %64 = vst [vmem:[%s101_s1] sm:$0xff] %v62_v51 }
  0x31   :  { %65 = vst [vmem:[%s101_s1 + $0x8] sm:$0xff] %v63_v53 }

</bundles_post_ra>
